<compile_context>
chip_gen: v5e
topology: v5e:2x2
jax: 0.10.0
libtpu: 0.0.40
codegen_flags: <defaults>
</compile_context>

<pallas_src>
import functools

import jax
import jax.numpy as jnp
from jax.experimental import pallas as pl
from jax.experimental.pallas import tpu as pltpu

_LANE = 128       # lane width: label axis padded to a multiple of this
_NEG_BIG = -1e30  # bias of padded label columns; exp(-1e30 - m) == 0.0 in f32


def _soft_label_head_kernel(x_ref, w_ref, b_ref, o_ref):
    # x_ref: [B, H]    pooled_output (dropout is identity at inference)
    # w_ref: [H, Lp]   weight.T, label axis zero-padded to a lane multiple
    # b_ref: [1, Lp]   bias row; padded label columns hold -1e30
    # o_ref: [B, Lp]   lane-dense softmax output (padded labels get prob 0.0)
    logits = jnp.dot(x_ref[...], w_ref[...], preferred_element_type=jnp.float32)
    logits = logits + b_ref[...]                     # broadcast [1,Lp] over B (VPU)
    m = jnp.max(logits, axis=-1, keepdims=True)
    e = jnp.exp(logits - m)
    denom = jnp.sum(e, axis=-1, keepdims=True)
    # approx=True would run on the otherwise-idle EUP, but this kernel is
    # latency-bound and the exact reciprocal keeps the 1e-5 match vs f32 ref.
    probs = e * pl.reciprocal(denom, approx=False)
    o_ref[...] = probs.astype(o_ref.dtype)


def prepare_classifier_params(weight, bias):
    """One-time parameter prep (hoist out of the per-step hot path).

    weight : [num_labels, hidden]  (PyTorch nn.Linear layout)
    bias   : [num_labels]

    Returns:
      w_pad    : [hidden, Lp] float32, weight.T with zero-padded label columns
      bias_row : [1, Lp] float32, bias with -1e30 in the padded label columns
                 (so those columns' softmax probability is exactly zero)
    where Lp = round_up(num_labels, 128).
    """
    num_labels, hidden = weight.shape
    lp = -(-num_labels // _LANE) * _LANE
    w_pad = jnp.zeros((hidden, lp), jnp.float32)
    w_pad = w_pad.at[:, :num_labels].set(weight.T.astype(jnp.float32))
    bias_row = jnp.full((1, lp), _NEG_BIG, jnp.float32)
    bias_row = bias_row.at[0, :num_labels].set(bias.astype(jnp.float32))
    return w_pad, bias_row


@functools.partial(jax.jit, static_argnames=("num_labels",))
def soft_label_head_forward(sequence_output, pooled_output, w_pad, bias_row,
                            *, num_labels):
    """SoftLabelHead.forward (labels=None path).

    sequence_output : unused by the reference forward (kept for signature parity)
    pooled_output   : [B, hidden] float32
    w_pad, bias_row : outputs of prepare_classifier_params (lane-padded)
    Returns (probs [B, num_labels], None).
    """
    del sequence_output  # unused by the PyTorch forward
    b, _ = pooled_output.shape
    _, lp = w_pad.shape

    # Dropout(p=0.1) is identity at inference time; pooled_output goes in raw.
    probs_pad = pl.pallas_call(
        _soft_label_head_kernel,
        out_shape=jax.ShapeDtypeStruct((b, lp), jnp.float32),
        in_specs=[
            pl.BlockSpec(memory_space=pltpu.MemorySpace.VMEM),
            pl.BlockSpec(memory_space=pltpu.MemorySpace.VMEM),
            pl.BlockSpec(memory_space=pltpu.MemorySpace.VMEM),
        ],
        out_specs=pl.BlockSpec(memory_space=pltpu.MemorySpace.VMEM),
    )(pooled_output.astype(jnp.float32), w_pad, bias_row)

    # TODO(synk): KLinverse loss path (labels is not None) relies on PyTorch
    # broadcasting of labels.view(-1) against (N, num_labels); only the
    # labels=None forward path exercised by the reference is implemented.
    loss = None
    # Slice back to num_labels for module parity; downstream consumers that can
    # accept the lane-padded [B, Lp] slab (pad cols are exact 0.0) may skip it.
    return probs_pad[:, :num_labels], loss


if __name__ == "__main__":
    # Small shapes consistent with the module: batch=8, seq=16, hidden=32, labels=8
    B, S, H, L = 8, 16, 32, 8

    key = jax.random.PRNGKey(0)
    k_seq, k_pool, k_w = jax.random.split(key, 3)

    sequence_output = jax.random.normal(k_seq, (B, S, H), dtype=jnp.float32)
    pooled_output = jax.random.normal(k_pool, (B, H), dtype=jnp.float32)

    # _init_weights(): weight ~ Normal(0, 0.02), bias = 0  (PyTorch [L, H] layout)
    weight = 0.02 * jax.random.normal(k_w, (L, H), dtype=jnp.float32)
    bias = jnp.zeros((L,), dtype=jnp.float32)

    # One-time parameter prep; stays resident under jit.
    w_pad, bias_row = prepare_classifier_params(weight, bias)

    probs, loss = soft_label_head_forward(
        sequence_output, pooled_output, w_pad, bias_row, num_labels=L
    )
    probs = jax.block_until_ready(probs)

    # Plain-JAX reference (f32-accurate matmul to match the kernel's MXU path).
    ref_logits = jnp.dot(pooled_output, weight.T,
                         precision=jax.lax.Precision.HIGHEST) + bias
    ref_probs = jax.nn.softmax(ref_logits, axis=1)

    assert loss is None
    assert probs.shape == (B, L)
    assert jnp.allclose(probs, ref_probs, atol=1e-5, rtol=1e-5)
    assert jnp.allclose(jnp.sum(probs, axis=1), 1.0, atol=1e-5)

    print("KERNEL_OK")
</pallas_src>

<mosaic_0001>
module attributes {stable_mosaic.version = 11 : i64} {
  func.func @_soft_label_head_kernel(%arg0: memref<8x32xf32, #tpu.memory_space<vmem>>, %arg1: memref<32x128xf32, #tpu.memory_space<vmem>>, %arg2: memref<1x128xf32, #tpu.memory_space<vmem>>, %arg3: memref<8x128xf32, #tpu.memory_space<vmem>>) attributes {dimension_semantics = [], scalar_prefetch = 0 : i64, scratch_operands = 0 : i64, tpu.core_type = #tpu.core_type<tc>} {
    %c0 = arith.constant 0 : index
    %c0_0 = arith.constant 0 : index
    %0 = vector.load %arg0[%c0, %c0_0] : memref<8x32xf32, #tpu.memory_space<vmem>>, vector<8x32xf32>
    %c0_1 = arith.constant 0 : index
    %c0_2 = arith.constant 0 : index
    %1 = vector.load %arg1[%c0_1, %c0_2] : memref<32x128xf32, #tpu.memory_space<vmem>>, vector<32x128xf32>
    %cst = arith.constant dense<0.000000e+00> : vector<8x128xf32>
    %2 = tpu.matmul %0, %1, %cst {dimension_numbers = #tpu.dot_dimension_numbers<[1], [0], [0], [1], [0, 0, 1, 1], [], []>} : vector<8x32xf32>, vector<32x128xf32>, vector<8x128xf32> -> vector<8x128xf32>
    %c0_3 = arith.constant 0 : index
    %c0_4 = arith.constant 0 : index
    %3 = vector.load %arg2[%c0_3, %c0_4] : memref<1x128xf32, #tpu.memory_space<vmem>>, vector<1x128xf32>
    %4 = vector.broadcast %3 : vector<1x128xf32> to vector<8x128xf32>
    %5 = arith.addf %2, %4 : vector<8x128xf32>
    %cst_5 = arith.constant dense<0xFF800000> : vector<8xf32>
    %6 = vector.multi_reduction <maximumf>, %5, %cst_5 [1] : vector<8x128xf32> to vector<8xf32>
    %7 = vector.shape_cast %6 : vector<8xf32> to vector<8x1xf32>
    %8 = vector.broadcast %7 : vector<8x1xf32> to vector<8x128xf32>
    %9 = arith.subf %5, %8 : vector<8x128xf32>
    %10 = math.exp %9 : vector<8x128xf32>
    %cst_6 = arith.constant dense<0.000000e+00> : vector<8xf32>
    %11 = vector.multi_reduction <add>, %10, %cst_6 [1] : vector<8x128xf32> to vector<8xf32>
    %12 = vector.shape_cast %11 : vector<8xf32> to vector<8x1xf32>
    %13 = tpu.reciprocal %12 : vector<8x1xf32> -> vector<8x1xf32>
    %14 = vector.broadcast %13 : vector<8x1xf32> to vector<8x128xf32>
    %15 = arith.mulf %10, %14 : vector<8x128xf32>
    %c0_7 = arith.constant 0 : index
    %c0_8 = arith.constant 0 : index
    %16 = vector.load %arg3[%c0_7, %c0_8] : memref<8x128xf32, #tpu.memory_space<vmem>>, vector<8x128xf32>
    tpu.vector_store %arg3[%c0_7, %c0_8], %15 {strides = array<i32>} : memref<8x128xf32, #tpu.memory_space<vmem>>, vector<8x128xf32>,
    return
  }
}

</mosaic_0001>

<bundles_post_ra>
// kernel: soft_label_head_forward.1
= control target key start
LH: loop header
LB: loop body
LE: loop exit
PB: predicated region body
PF: predicated region fallthrough
CT: control target
= control target key end

     0   :  { %8 = vsyncpa [#allocation3], 0  ;;  %s245_s0 = inlined_call_operand.hbm [shape: f32[8,32], index: 0, kind: input, shape index: {}]   ;;  %s246_s1 = inlined_call_operand.hbm [shape: f32[32,128], index: 1, kind: input, shape index: {}]   ;;  %s247_s2 = inlined_call_operand.vmem [shape: f32[1,128], index: 2, kind: input, shape index: {}]   ;;  %s248_s3 = inlined_call_operand.hbm [shape: f32[8,128], index: 3, kind: output, shape index: {}]  }
   0x1   :  { %9 = vsyncpa [#allocation6], 0 }
   0x2   :  { %10 = vsyncpa [#allocation4], 0  ;;  %s16_s14 = sshll.u32 %s245_s0, 4  ;;  %s208_s15 = smov [#allocation2]   ;;  %s17_s14 = int_to_ptr.hbm [resolvable:$true] %s16_s14 }
   0x3   :  { %s18_s16 = sshll.u32 %s208_s15, 4  ;;  %s26_s19 = sshll.u32 %s246_s1, 4  ;;  %s19_s16 = int_to_ptr.vmem [resolvable:$true] %s18_s16  ;;  %s27_s19 = int_to_ptr.hbm [resolvable:$true] %s26_s19 }
   0x4   :  { %21 = dma.hbm_to_vmem [thread:$0]  %s17_s14, 128, %s19_s16, [#allocation3]  }
   0x5   :  { %s209_s20 = smov [#allocation5]   ;;  %s210_s22 = smov 128  }
   0x6   :  { %s28_s21 = sshll.u32 %s209_s20, 4  ;;  %s211_s23 = smov 8   ;;  %s29_s21 = int_to_ptr.vmem [resolvable:$true] %s28_s21 }
   0x7   :  { %34 = dma.hbm_to_vmem [thread:$0]  %s27_s19, 512, %s29_s21, [#allocation6], %s210_s22, %s210_s22, %s211_s23  }
   0x8   :  { %202 = dma.done.wait [#allocation3], 128  }
   0x9   :  { %203 = vsyncadd [#allocation3], 4294967168 }
   0xa   :  { %204 = dma.done.wait [#allocation6], 512  }
   0xb   :  { %205 = vsyncadd [#allocation6], 4294966784  ;;  %v49_v0 = vld [vmem:[#allocation5 + $0x18] sm:$0xff]  ;;  %v48_v1 = vld [vmem:[#allocation5 + $0x10] sm:$0xff]  ;;  %vm54_vm0 = vcmask 261120   ;;  %s108_s27 = sshll.u32 %s248_s3, 4  ;;  %s109_s27 = int_to_ptr.hbm [resolvable:$true] %s108_s27 }
   0xc   :  { %70 = vmatpush.msra.mxu0 %v49_v0  ;;  %v47_v2 = vld [vmem:[#allocation5 + $0x8] sm:$0xff]  ;;  %v46_v3 = vld [vmem:[#allocation5] sm:$0xff]  ;;  %v45_v4 = vld [vmem:[#allocation2] sm:$0xff] }
   0xd   :  { %v125_v5 = vld [vmem:[%s247_s2] ss:$0 sm:$0xff]  ;;  %s212_s2 = smov [#allocation7]  }
   0xe   :  { %71 = vmatpush.msra.mxu0 %v48_v1  ;;  %s106_s24 = sshll.u32 %s212_s2, 4  ;;  %s107_s24 = int_to_ptr.vmem [resolvable:$true] %s106_s24 }
  0x10   :  { %72 = vmatpush.msra.mxu0 %v47_v2 }
  0x12   :  { %73 = vmatpush.msra.mxu0 %v46_v3 }
  0x13   :  { %119 = vmatmul.msk.f32.vlgmr.msra.gmra.mxu0 %vm54_vm0, %v45_v4 }
  0x90   :  { %v75_v6 = vpop.f32.mrf.mxu0 }
  0x91   :  { %v76_v7 = vadd.f32 %v125_v5, %v75_v6 }
  0x93   :  { %78 = vmax.xlane.f32.xlu0 %v76_v7 }
 0x106   :  { %v79_v8 = vpop.xlane.xlu0 %78 }
 0x107   :  { %v80_v9 = vsub.f32 %v76_v7, %v79_v8 }
 0x109   :  { %v81_v10 = vmul.f32 1.442695, %v80_v9 }
 0x10b   :  { %126 = vpow2.f32 %v81_v10 }
 0x111   :  { %v127_v11 = vpop.eup %126 }
 0x112   :  { %83 = vadd.xlane.f32.xlu0 %v127_v11 }
 0x185   :  { %v84_v12 = vpop.xlane.xlu0 %83 }
 0x186   :  { %128 = vrcp.f32 %v84_v12  ;;  %v96_v16 = vand.u32 2147483648, %v84_v12  ;;  %v94_v18 = vand.u32 2147483647, %v84_v12  ;;  %vm90_vm2 = vweird.f32 %v84_v12 }
 0x188   :  { %v97_v20 = vor.u32 1.1754944e-38, %v96_v16  ;;  %vm95_vm4 = vcmp.eq.f32.partialorder %v94_v18, 8.507059e+37 }
 0x18c   :  { %v129_v13 = vpop.eup %128 }
 0x18d   :  { %v86_v14 = vmul.f32 %v129_v13, %v84_v12  ;;  %vm91_vm1 = vweird.f32 %v129_v13 }
 0x18e   :  { %vm92_vm3 = vmor %vm90_vm2, %vm91_vm1 }
 0x18f   :  { %v87_v15 = vsub.f32 1.0, %v86_v14 }
 0x191   :  { %v88_v17 = vmul.f32 %v129_v13, %v87_v15 }
 0x193   :  { %v89_v19 = vadd.f32 %v129_v13, %v88_v17 }
 0x195   :  { %v93_v21 = vsel %vm92_vm3, %v129_v13, %v89_v19 }
 0x196   :  { %v98_v22 = vsel %vm95_vm4, %v97_v20, %v93_v21 }
 0x197   :  { %v99_v23 = vmul.f32 %v127_v11, %v98_v22 }
 0x199   :  { %100 = vst [vmem:[#allocation7] sm:$0xff] %v99_v23 }
 0x19a   :  { %111 = dma.vmem_to_hbm [thread:$0]  %s107_s24, 128, %s109_s27, [#allocation4]  }
 0x19b   :  { %206 = dma.done.wait [#allocation4], 128  }
 0x19c   :  { %207 = vsyncadd [#allocation4], 4294967168 }
 0x19d   :  { %116 = vsyncpa [#allocation3], 1 }
 0x19e   :  { %117 = vsyncpa [#allocation6], 1 }
 0x19f   :  { %118 = vsyncpa [#allocation4], 1 }

</bundles_post_ra>
